<compile_context>
chip_gen: v7x
topology: tpu7x:2x2x1
jax: 0.10.0
libtpu: 0.0.40
codegen_flags: <defaults>
</compile_context>

<pallas_src>
import jax
import jax.numpy as jnp
from jax.experimental import pallas as pl
from jax.experimental.pallas import tpu as pltpu


# ----------------------------------------------------------------------------
# Fused MHSA kernel: one (batch, head) tile per grid step.
# ----------------------------------------------------------------------------
def mhsa_kernel(x_ref, wq_ref, wk_ref, wv_ref, bq_ref, bk_ref, bv_ref, o_ref):
    # x_ref : (1, C, N)   full pixel slab for this batch element (C-major)
    # w*_ref: (Dh, C)     per-head 1x1-conv weight slab (out, in)
    # b*_ref: (Dh, 1)     per-head bias column
    # o_ref : (1, Dh, N)  per-head output slab (lane axis = N)
    x = x_ref[0]                                                   # (C, N)

    # 1x1-conv projections for this head: (Dh, C) @ (C, N) on the MXU.
    q = jnp.dot(wq_ref[...], x, preferred_element_type=jnp.float32) + bq_ref[...]
    k = jnp.dot(wk_ref[...], x, preferred_element_type=jnp.float32) + bk_ref[...]
    v = jnp.dot(wv_ref[...], x, preferred_element_type=jnp.float32) + bv_ref[...]

    # energy[i, j] = sum_d q[d, i] * k[d, j]  -> (N, N)
    # (small (Dh, N) transpose goes to the XLU; matmul stays standard form)
    energy = jnp.dot(q.T, k, preferred_element_type=jnp.float32)

    # Row-wise softmax over the key axis (matches torch.Softmax(dim=-1)).
    m = jnp.max(energy, axis=-1, keepdims=True)
    e = jnp.exp(energy - m)
    att = e / jnp.sum(e, axis=-1, keepdims=True)

    # out[d, i] = sum_j v[d, j] * att[i, j]   (rhs-transposed matmul form)
    out = jax.lax.dot_general(
        v, att, (((1,), (1,)), ((), ())), preferred_element_type=jnp.float32)

    o_ref[0] = out.astype(o_ref.dtype)                             # (Dh, N)


# ----------------------------------------------------------------------------
# Public wrapper: NCHW in / NCHW out (PyTorch convention).
# ----------------------------------------------------------------------------
def mhsa_forward(x_nchw, params, heads):
    B, C, W, H = x_nchw.shape
    assert C % heads == 0, "n_dims must be divisible by heads"
    Dh = C // heads
    N = W * H

    x = x_nchw.reshape(B, C, N)                 # pure reshape, no transpose
    bq = params["bq"].reshape(C, 1)
    bk = params["bk"].reshape(C, 1)
    bv = params["bv"].reshape(C, 1)

    cost = pl.CostEstimate(
        flops=6 * B * C * C * N + 4 * B * C * N * N,
        transcendentals=B * heads * N * N,
        bytes_accessed=4 * (2 * B * C * N + 3 * C * C + 3 * C),
    )

    out = pl.pallas_call(
        mhsa_kernel,
        out_shape=jax.ShapeDtypeStruct((B, C, N), x_nchw.dtype),
        grid_spec=pltpu.PrefetchScalarGridSpec(
            num_scalar_prefetch=0,
            grid=(B, heads),
            in_specs=[
                pl.BlockSpec((1, C, N), lambda b, h: (b, 0, 0)),   # x
                pl.BlockSpec((Dh, C), lambda b, h: (h, 0)),        # Wq slab
                pl.BlockSpec((Dh, C), lambda b, h: (h, 0)),        # Wk slab
                pl.BlockSpec((Dh, C), lambda b, h: (h, 0)),        # Wv slab
                pl.BlockSpec((Dh, 1), lambda b, h: (h, 0)),        # bq
                pl.BlockSpec((Dh, 1), lambda b, h: (h, 0)),        # bk
                pl.BlockSpec((Dh, 1), lambda b, h: (h, 0)),        # bv
            ],
            out_specs=pl.BlockSpec((1, Dh, N), lambda b, h: (b, h, 0)),
        ),
        compiler_params=pltpu.CompilerParams(
            dimension_semantics=("parallel", "parallel")),
        cost_estimate=cost,
    )(x, params["wq"], params["wk"], params["wv"], bq, bk, bv)

    return out.reshape(B, C, W, H)


# ----------------------------------------------------------------------------
# Pure-JAX reference (mirrors the PyTorch forward exactly) — correctness only.
# ----------------------------------------------------------------------------
def mhsa_ref(x_nchw, params, heads):
    B, C, W, H = x_nchw.shape
    Dh, N = C // heads, W * H
    x = x_nchw.reshape(B, C, N).astype(jnp.float32)

    def proj(w, b):
        y = jnp.einsum("oc,bcn->bon", w.astype(jnp.float32), x) + b[None, :, None]
        return y.reshape(B, heads, Dh, N)

    q = proj(params["wq"], params["bq"])
    k = proj(params["wk"], params["bk"])
    v = proj(params["wv"], params["bv"])
    energy = jnp.einsum("bhdi,bhdj->bhij", q, k)       # q^T k
    att = jax.nn.softmax(energy, axis=-1)
    out = jnp.einsum("bhdj,bhij->bhdi", v, att)        # v @ att^T
    return out.reshape(B, C, W, H)


if __name__ == "__main__":
    # Small shapes consistent with the module: n_dims=32, heads=4 (Dh=8),
    # 8x8 spatial (N=64), batch=2.
    B, C, W, H, heads = 2, 32, 8, 8, 4

    key = jax.random.PRNGKey(0)
    kx, kq, kk, kv, kbq, kbk, kbv = jax.random.split(key, 7)
    x = jax.random.normal(kx, (B, C, W, H), jnp.float32)
    params = dict(
        wq=0.2 * jax.random.normal(kq, (C, C), jnp.float32),   # (out, in)
        wk=0.2 * jax.random.normal(kk, (C, C), jnp.float32),
        wv=0.2 * jax.random.normal(kv, (C, C), jnp.float32),
        bq=0.1 * jax.random.normal(kbq, (C,), jnp.float32),
        bk=0.1 * jax.random.normal(kbk, (C,), jnp.float32),
        bv=0.1 * jax.random.normal(kbv, (C,), jnp.float32),
    )

    out = jax.block_until_ready(mhsa_forward(x, params, heads))
    ref = jax.block_until_ready(mhsa_ref(x, params, heads))

    assert out.shape == (B, C, W, H), out.shape
    assert jnp.allclose(out, ref, rtol=1e-4, atol=1e-4), float(
        jnp.max(jnp.abs(out - ref)))
    print("KERNEL_OK")
</pallas_src>

<mosaic_0001>
module attributes {stable_mosaic.version = 11 : i64} {
  func.func @mhsa_kernel(%arg0: i32, %arg1: i32, %arg2: memref<1x32x64xf32, #tpu.memory_space<vmem>>, %arg3: memref<8x32xf32, #tpu.memory_space<vmem>>, %arg4: memref<8x32xf32, #tpu.memory_space<vmem>>, %arg5: memref<8x32xf32, #tpu.memory_space<vmem>>, %arg6: memref<8x1xf32, #tpu.memory_space<vmem>>, %arg7: memref<8x1xf32, #tpu.memory_space<vmem>>, %arg8: memref<8x1xf32, #tpu.memory_space<vmem>>, %arg9: memref<1x8x64xf32, #tpu.memory_space<vmem>>) attributes {dimension_semantics = [#tpu.dimension_semantics<parallel>, #tpu.dimension_semantics<parallel>], iteration_bounds = array<i64: 2, 4>, scalar_prefetch = 0 : i64, scratch_operands = 0 : i64, tpu.core_type = #tpu.core_type<tc>, window_params = [{transform_indices = @transform_0, window_bounds = array<i64: 1, 32, 64>}, {transform_indices = @transform_1, window_bounds = array<i64: 8, 32>}, {transform_indices = @transform_2, window_bounds = array<i64: 8, 32>}, {transform_indices = @transform_3, window_bounds = array<i64: 8, 32>}, {transform_indices = @transform_4, window_bounds = array<i64: 8, 1>}, {transform_indices = @transform_5, window_bounds = array<i64: 8, 1>}, {transform_indices = @transform_6, window_bounds = array<i64: 8, 1>}, {transform_indices = @transform_7, window_bounds = array<i64: 1, 8, 64>}]} {
    %c0 = arith.constant 0 : index
    %c0_0 = arith.constant 0 : index
    %c0_1 = arith.constant 0 : index
    %0 = vector.load %arg2[%c0, %c0_0, %c0_1] : memref<1x32x64xf32, #tpu.memory_space<vmem>>, vector<1x32x64xf32>
    %1 = vector.shape_cast %0 : vector<1x32x64xf32> to vector<32x64xf32>
    %c0_2 = arith.constant 0 : index
    %c0_3 = arith.constant 0 : index
    %2 = vector.load %arg3[%c0_2, %c0_3] : memref<8x32xf32, #tpu.memory_space<vmem>>, vector<8x32xf32>
    %cst = arith.constant dense<0.000000e+00> : vector<8x64xf32>
    %3 = tpu.matmul %2, %1, %cst {dimension_numbers = #tpu.dot_dimension_numbers<[1], [0], [0], [1], [0, 0, 1, 1], [], []>} : vector<8x32xf32>, vector<32x64xf32>, vector<8x64xf32> -> vector<8x64xf32>
    %c0_4 = arith.constant 0 : index
    %c0_5 = arith.constant 0 : index
    %4 = vector.load %arg6[%c0_4, %c0_5] : memref<8x1xf32, #tpu.memory_space<vmem>>, vector<8x1xf32>
    %5 = vector.broadcast %4 : vector<8x1xf32> to vector<8x64xf32>
    %6 = arith.addf %3, %5 : vector<8x64xf32>
    %c0_6 = arith.constant 0 : index
    %c0_7 = arith.constant 0 : index
    %7 = vector.load %arg4[%c0_6, %c0_7] : memref<8x32xf32, #tpu.memory_space<vmem>>, vector<8x32xf32>
    %cst_8 = arith.constant dense<0.000000e+00> : vector<8x64xf32>
    %8 = tpu.matmul %7, %1, %cst_8 {dimension_numbers = #tpu.dot_dimension_numbers<[1], [0], [0], [1], [0, 0, 1, 1], [], []>} : vector<8x32xf32>, vector<32x64xf32>, vector<8x64xf32> -> vector<8x64xf32>
    %c0_9 = arith.constant 0 : index
    %c0_10 = arith.constant 0 : index
    %9 = vector.load %arg7[%c0_9, %c0_10] : memref<8x1xf32, #tpu.memory_space<vmem>>, vector<8x1xf32>
    %10 = vector.broadcast %9 : vector<8x1xf32> to vector<8x64xf32>
    %11 = arith.addf %8, %10 : vector<8x64xf32>
    %c0_11 = arith.constant 0 : index
    %c0_12 = arith.constant 0 : index
    %12 = vector.load %arg5[%c0_11, %c0_12] : memref<8x32xf32, #tpu.memory_space<vmem>>, vector<8x32xf32>
    %cst_13 = arith.constant dense<0.000000e+00> : vector<8x64xf32>
    %13 = tpu.matmul %12, %1, %cst_13 {dimension_numbers = #tpu.dot_dimension_numbers<[1], [0], [0], [1], [0, 0, 1, 1], [], []>} : vector<8x32xf32>, vector<32x64xf32>, vector<8x64xf32> -> vector<8x64xf32>
    %c0_14 = arith.constant 0 : index
    %c0_15 = arith.constant 0 : index
    %14 = vector.load %arg8[%c0_14, %c0_15] : memref<8x1xf32, #tpu.memory_space<vmem>>, vector<8x1xf32>
    %15 = vector.broadcast %14 : vector<8x1xf32> to vector<8x64xf32>
    %16 = arith.addf %13, %15 : vector<8x64xf32>
    %17 = tpu.transpose %6, [1, 0] : vector<8x64xf32> -> vector<64x8xf32>
    %cst_16 = arith.constant dense<0.000000e+00> : vector<64x64xf32>
    %18 = tpu.matmul %17, %11, %cst_16 {dimension_numbers = #tpu.dot_dimension_numbers<[1], [0], [0], [1], [0, 0, 1, 1], [], []>} : vector<64x8xf32>, vector<8x64xf32>, vector<64x64xf32> -> vector<64x64xf32>
    %cst_17 = arith.constant dense<0xFF800000> : vector<64xf32>
    %19 = vector.multi_reduction <maximumf>, %18, %cst_17 [1] : vector<64x64xf32> to vector<64xf32>
    %20 = vector.shape_cast %19 : vector<64xf32> to vector<64x1xf32>
    %21 = vector.broadcast %20 : vector<64x1xf32> to vector<64x64xf32>
    %22 = arith.subf %18, %21 : vector<64x64xf32>
    %23 = math.exp %22 : vector<64x64xf32>
    %cst_18 = arith.constant dense<0.000000e+00> : vector<64xf32>
    %24 = vector.multi_reduction <add>, %23, %cst_18 [1] : vector<64x64xf32> to vector<64xf32>
    %25 = vector.shape_cast %24 : vector<64xf32> to vector<64x1xf32>
    %26 = vector.broadcast %25 : vector<64x1xf32> to vector<64x64xf32>
    %27 = arith.divf %23, %26 : vector<64x64xf32>
    %cst_19 = arith.constant dense<0.000000e+00> : vector<8x64xf32>
    %28 = tpu.matmul %16, %27, %cst_19 {dimension_numbers = #tpu.dot_dimension_numbers<[1], [1], [0], [0], [0, 0, 1, 0], [], []>} : vector<8x64xf32>, vector<64x64xf32>, vector<8x64xf32> -> vector<8x64xf32>
    %c0_20 = arith.constant 0 : index
    %c0_21 = arith.constant 0 : index
    %c0_22 = arith.constant 0 : index
    %29 = vector.load %arg9[%c0_20, %c0_21, %c0_22] : memref<1x8x64xf32, #tpu.memory_space<vmem>>, vector<1x8x64xf32>
    %30 = vector.shape_cast %29 : vector<1x8x64xf32> to vector<8x64xf32>
    %31 = vector.shape_cast %28 : vector<8x64xf32> to vector<1x8x64xf32>
    tpu.vector_store %arg9[%c0_20, %c0_21, %c0_22], %31 {strides = array<i32>} : memref<1x8x64xf32, #tpu.memory_space<vmem>>, vector<1x8x64xf32>,
    return
  }
  func.func @transform_0(%arg0: i32, %arg1: i32) -> (i32, i32, i32) {
    %c0_i32 = arith.constant 0 : i32
    %c0_i32_0 = arith.constant 0 : i32
    %c0_i32_1 = arith.constant 0 : i32
    return %arg0, %c0_i32, %c0_i32_0 : i32, i32, i32
  }
  func.func @transform_1(%arg0: i32, %arg1: i32) -> (i32, i32) {
    %c0_i32 = arith.constant 0 : i32
    %c0_i32_0 = arith.constant 0 : i32
    return %arg1, %c0_i32 : i32, i32
  }
  func.func @transform_2(%arg0: i32, %arg1: i32) -> (i32, i32) {
    %c0_i32 = arith.constant 0 : i32
    %c0_i32_0 = arith.constant 0 : i32
    return %arg1, %c0_i32 : i32, i32
  }
  func.func @transform_3(%arg0: i32, %arg1: i32) -> (i32, i32) {
    %c0_i32 = arith.constant 0 : i32
    %c0_i32_0 = arith.constant 0 : i32
    return %arg1, %c0_i32 : i32, i32
  }
  func.func @transform_4(%arg0: i32, %arg1: i32) -> (i32, i32) {
    %c0_i32 = arith.constant 0 : i32
    %c0_i32_0 = arith.constant 0 : i32
    return %arg1, %c0_i32 : i32, i32
  }
  func.func @transform_5(%arg0: i32, %arg1: i32) -> (i32, i32) {
    %c0_i32 = arith.constant 0 : i32
    %c0_i32_0 = arith.constant 0 : i32
    return %arg1, %c0_i32 : i32, i32
  }
  func.func @transform_6(%arg0: i32, %arg1: i32) -> (i32, i32) {
    %c0_i32 = arith.constant 0 : i32
    %c0_i32_0 = arith.constant 0 : i32
    return %arg1, %c0_i32 : i32, i32
  }
  func.func @transform_7(%arg0: i32, %arg1: i32) -> (i32, i32, i32) {
    %c0_i32 = arith.constant 0 : i32
    %c0_i32_0 = arith.constant 0 : i32
    return %arg0, %arg1, %c0_i32 : i32, i32, i32
  }
}

</mosaic_0001>

<bundles_post_ra>
// kernel: tpu_custom_call.1
= control target key start
LH: loop header
LB: loop body
LE: loop exit
PB: predicated region body
PF: predicated region fallthrough
CT: control target
= control target key end

     0   :  { %s2122_s0 = inlined_call_operand.vmem [shape: f32[2,32,64], index: 0, kind: input, shape index: {}]   ;;  %s2123_s1 = inlined_call_operand.vmem [shape: f32[32,32], index: 1, kind: input, shape index: {}]   ;;  %s2124_s2 = inlined_call_operand.hbm [shape: f32[32,32], index: 2, kind: input, shape index: {}]   ;;  %s2125_s3 = inlined_call_operand.hbm [shape: f32[32,32], index: 3, kind: input, shape index: {}]   ;;  %s2126_s4 = inlined_call_operand.vmem [shape: f32[32,1], index: 4, kind: input, shape index: {}]   ;;  %s2127_s5 = inlined_call_operand.vmem [shape: f32[32,1], index: 5, kind: input, shape index: {}]   ;;  %s2128_s6 = inlined_call_operand.vmem [shape: f32[32,1], index: 6, kind: input, shape index: {}]   ;;  %s2129_s7 = inlined_call_operand.hbm [shape: f32[2,32,64], index: 7, kind: output, shape index: {}]  }
   0x1   :  { %2139 = sst [smem:[#allocation18_spill]] %s2124_s2 }
   0x2   :  { %12 = vsyncpa [#allocation3], 0 }
   0x3   :  { %14 = vsyncpa [#allocation3 + $0x1], 0 }
   0x4   :  { %15 = vsyncpa [#allocation6], 0 }
   0x5   :  { %17 = vsyncpa [#allocation6 + $0x1], 0 }
   0x6   :  { %18 = vsyncpa [#allocation4], 0 }
   0x7   :  { %20 = vsyncpa [#allocation4 + $0x1], 0  ;;  %s1765_s24 = smov 0   ;;  %s1767_s25 = smov 0  }
   0x8   :  { %s1769_s26 = smov 0   ;;  %s1771_s27 = smov 0  }
   0x9   :  { %s1773_s28 = smov 0   ;;  %s1775_s29 = smov 0  }
   0xa   :  { %s1777_s30 = smov 0   ;;  %s1779_s8 = smov 0  }
   0xb   :  { %s1781_s9 = smov 0   ;;  %s1783_s10 = smov 0  }
   0xc   :  { %s1785_s11 = smov 0  }
   0xd LB: > { %2140 = sst [smem:[#allocation11_spill]] %s1696_s29  ;;  %s1209_s12 = sadd.s32 4294967295, %s1716_s11   ;;  %s1716_s11 = sphi %s1785_s11, %s26_s11   ;;  %s1712_s10 = sphi %s1783_s10, %s2170_s10   ;;  %s1708_s9 = sphi %s1781_s9, %s2169_s9   ;;  %s1704_s8 = sphi %s1779_s8, %s2168_s8   ;;  %s1700_s30 = sphi %s1777_s30, %s2167_s30   ;;  %s1696_s29 = sphi %s1775_s29, %s2166_s29   ;;  %s1692_s28 = sphi %s1773_s28, %s2175_s28   ;;  %s1688_s27 = sphi %s1771_s27, %s2174_s27   ;;  %s1684_s26 = sphi %s1769_s26, %s2173_s26   ;;  %s1680_s25 = sphi %s1767_s25, %s2172_s25   ;;  %s1676_s24 = sphi %s1765_s24, %s2171_s24  }
   0xe   : > { %2141 = sst [smem:[#allocation12_spill]] %s1708_s9  ;;  %s1210_s13 = sadd.s32 4294967294, %s1716_s11  }
   0xf   : > { %2142 = sst [smem:[#allocation13_spill]] %s1712_s10  ;;  %s35_s14 = sadd.s32 1, %s1708_s9 }
  0x10   : > { %s38_s15 = sadd.s32 1, %s1712_s10  ;;  %p36_p0 = scmp.ge.s32.totalorder %s35_s14, 4 }
  0x11   : > { %s97_s16 = sadd.s32 1, %s1696_s29  ;;  %p104_p1 = scmp.ne.s32.totalorder %s1696_s29, %s1692_s28 }
  0x12   : > { %p105_p2 = scmp.eq.s32.totalorder %s1716_s11, 0  ;;  %s2177_s14 = smov (%p36_p0, %s35_s14), 0 }
  0x13   : > { %2143 = sst [smem:[#allocation14_spill]] %s2177_s14  ;;  %s2179_s15 = smov (!%p36_p0, %s38_s15), %s1712_s10 }
  0x14   : > { %s94_s17 = ssub.s32 %s1708_s9, %s2177_s14  ;;  %p1831_p3 = por %p105_p2, %p104_p1 }
  0x15   : > { %p40_p4 = scmp.ge.s32.totalorder %s2179_s15, 2  ;;  %p95_p5 = scmp.eq.s32.totalorder %s94_s17, 0 }
  0x16   : > { %p110_p6 = scmp.ne.s32.totalorder %s1692_s28, %s1688_s27  ;;  %p111_p7 = scmp.eq.s32.totalorder %s1209_s12, 0 }
  0x17   : > { %s2181_s15 = smov (%p40_p4, %s2179_s15), 0  ;;  %s229_s23 = sadd.s32 1, %s1684_s26 }
  0x18   : > { %2145 = sst [smem:[#allocation15_spill]] %s2181_s15  ;;  %p1841_p8 = por %p111_p7, %p110_p6 }
  0x19   : > { %s1839_s19 = scalar_select %p95_p5, %s1696_s29, %s97_s16  }
  0x1a   : > { %s2147_s20 = scalar_select %p1841_p8, 1, 0 }
  0x1b   : > { %2146 = sst [smem:[#allocation16_spill]] %s1839_s19  ;;  %s224_s21 = ssub.s32 %s1712_s10, %s2181_s15 }
  0x1c   : > { %s226_s22 = sor.u32 %s224_s21, %s94_s17  ;;  %p239_p10 = scmp.ne.s32.totalorder %s1684_s26, %s1680_s25 }
  0x1d   : > { %p227_p9 = scmp.eq.s32.totalorder %s226_s22, 0  ;;  %p240_p11 = scmp.eq.s32.totalorder %s1209_s12, 7 }
  0x1e   : > { %p245_p12 = scmp.ne.s32.totalorder %s1680_s25, %s1676_s24  ;;  %p246_p0 = scmp.eq.s32.totalorder %s1210_s13, 7 }
  0x1f   : > { %s1853_s27 = scalar_select %p227_p9, %s1684_s26, %s229_s23  }
  0x20   : > { %p1855_p13 = por %p240_p11, %p239_p10  ;;  %p1403_p1 = scmp.lt.s32.totalorder %s1716_s11, 8 }
  0x21   : > { %2148 = sst [smem:[#allocation17_spill]] %s1853_s27  ;;  %p1860_p2 = por %p246_p0, %p245_p12 }
  0x22   : > { %s2149_s16 = scalar_select %p1855_p13, 1, 0 }
  0x23   : > { %s2150_s14 = scalar_select %p1860_p2, 1, 0 }
  0x24   : > { %s1865_s17 = sand.u32 1, %s1696_s29   ;;  %s2134_s21 = sshll.u32 %s1708_s9, 7 }
  0x25   : > { %s2133_s12 = sshll.u32 %s1865_s17, 3  ;;  %s2151_s2 = sld [smem:[#allocation18_spill]] }
  0x26   : > { %s285_s13 = scalar_lea.vmem [#allocation2], %s2133_s12  ;;  %p1882_p4 = pnand %p1403_p1, %p1831_p3 }
  0x27   : > { %s292_s10 = sshll.u32 %s285_s13, 4  ;;  %s282_s22 = scalar_lea.sflag [#allocation3], %s1865_s17  ;;  %s1878_s10 = int_to_ptr.vmem [resolvable:$true] %s292_s10 }
  0x28   : > { %p1532_p9 = pneg %p1882_p4 }
  0x2b   : > { %s1874_s15 = scalar_lea.hbm %s2151_s2, %s2134_s21  ;;  %s1535_s18 = scalar_lea.hbm %s2151_s2, 512 }
  0x2c   : > { %s1530_s23 = scalar_lea.hbm %s1874_s15, 128  ;;  %p1536_p3 = scmp.lt.u32.totalorder %s1874_s15, %s2151_s2 }
  0x2d   : > { %p1531_p7 = scmp.ne.s32.totalorder %s1874_s15, %s1530_s23  ;;  %p1537_p12 = scmp.lt.u32.totalorder %s1535_s18, %s1530_s23 }
  0x2e   : > { %p1539_p1 = scmp.lt.u32.totalorder %s1530_s23, %s1874_s15 }
  0x2f   : > { %p1533_p10 = pnand %p1532_p9, %p1531_p7  ;;  %p1538_p0 = por %p1537_p12, %p1536_p3 }
  0x31   : > { %p1534_p11 = pneg %p1533_p10  ;;  %p1540_p5 = por %p1539_p1, %p1538_p0 }
  0x33   : > { %p1541_p6 = pnand %p1540_p5, %p1534_p11 }
  0x35   : > { %1544 = shalt.err (!%p1541_p6)
}
  0x36   : > { %s1545_s27 = scalar_lea.vmem %s1878_s10, 128  ;;  %s1718_s12 = smov [#allocation2]  }
  0x37   : > { %p1546_p7 = scmp.ne.s32.totalorder %s1878_s10, %s1545_s27  ;;  %s1550_s13 = sshll.u32 %s1718_s12, 4  ;;  %s1551_s13 = int_to_ptr.vmem [resolvable:$false] %s1550_s13 }
  0x38   : > { %s1552_s29 = scalar_lea.vmem %s1551_s13, 256  ;;  %p1553_p13 = scmp.lt.s32.totalorder %s1878_s10, %s1551_s13 }
  0x39   : > { %p1548_p10 = pnand %p1546_p7, %p1532_p9  ;;  %p1554_p3 = scmp.lt.s32.totalorder %s1552_s29, %s1545_s27 }
  0x3b   : > { %p1549_p2 = pneg %p1548_p10  ;;  %p1555_p12 = por %p1554_p3, %p1553_p13 }
  0x3d   : > { %p1556_p0 = pnand %p1555_p12, %p1549_p2 }
  0x3f   : > { %1559 = shalt.err (!%p1556_p0)
}
  0x40   : > { %1395 = dma.hbm_to_vmem [thread:$0]  (!%p1882_p4), %s1874_s15, 128, %s1878_s10, %s282_s22  }
  0x41   : > { %p2153_p5 = scmp.lt.s32.totalorder %s1716_s11, 9  ;;  %p2154_p6 = scmp.ge.s32.totalorder %s1716_s11, 1 }
  0x42   : > { %s2156_s27 = sshll.u32 %s1708_s9, 7  ;;  %s2157_s13 = sshll.u32 %s1865_s17, 3 }
  0x43   : > { %p1918_p11 = pnand %p2154_p6, %p2153_p5  ;;  %s1927_s12 = scalar_lea.hbm %s2125_s3, %s2156_s27 }
  0x44   : > { %s303_s29 = scalar_lea.vmem [#allocation5], %s2157_s13  ;;  %s300_s10 = scalar_lea.sflag [#allocation6], %s1865_s17 }
  0x45   : > { %s2155_s21 = scalar_select %p1918_p11, 1, 0 }
  0x46   : > { %s310_s2 = sshll.u32 %s303_s29, 4  ;;  %s1560_s15 = scalar_lea.hbm %s1927_s12, 128  ;;  %s311_s2 = int_to_ptr.vmem [resolvable:$true] %s310_s2 }
  0x47   : > { %p1561_p13 = scmp.ne.s32.totalorder %s1927_s12, %s1560_s15  ;;  %s1565_s27 = scalar_lea.hbm %s2125_s3, 512 }
  0x48   : > { %p1566_p7 = scmp.lt.u32.totalorder %s1927_s12, %s2125_s3  ;;  %p1567_p10 = scmp.lt.u32.totalorder %s1565_s27, %s1560_s15 }
  0x49   : > { %p1563_p2 = pnand %p1561_p13, %p1532_p9  ;;  %p1569_p12 = scmp.lt.u32.totalorder %s1560_s15, %s1927_s12 }
  0x4a   : > { %p1568_p3 = por %p1567_p10, %p1566_p7 }
  0x4b   : > { %p1564_p1 = pneg %p1563_p2 }
  0x4c   : > { %p1570_p0 = por %p1569_p12, %p1568_p3 }
  0x4e   : > { %p1571_p5 = pnand %p1570_p0, %p1564_p1 }
  0x50   : > { %1574 = shalt.err (!%p1571_p5)
}
  0x51   : > { %s1575_s17 = scalar_lea.vmem %s311_s2, 128  ;;  %s1719_s13 = smov [#allocation5]  }
  0x52   : > { %p1576_p6 = scmp.ne.s32.totalorder %s311_s2, %s1575_s17  ;;  %s1580_s9 = sshll.u32 %s1719_s13, 4  ;;  %s1581_s9 = int_to_ptr.vmem [resolvable:$false] %s1580_s9 }
  0x53   : > { %s1582_s29 = scalar_lea.vmem %s1581_s9, 256  ;;  %p1583_p8 = scmp.lt.s32.totalorder %s311_s2, %s1581_s9 }
  0x54   : > { %p1578_p13 = pnand %p1576_p6, %p1532_p9  ;;  %p1584_p11 = scmp.lt.s32.totalorder %s1582_s29, %s1575_s17 }
  0x56   : > { %p1579_p2 = pneg %p1578_p13  ;;  %p1585_p7 = por %p1584_p11, %p1583_p8 }
  0x58   : > { %p1586_p10 = pnand %p1585_p7, %p1579_p2 }
  0x5a   : > { %1589 = shalt.err (!%p1586_p10)
}
  0x5b   : > { %1398 = dma.hbm_to_vmem [thread:$0]  (!%p1882_p4), %s1927_s12, 128, %s311_s2, %s300_s10  }
  0x5c   : > { %p2158_p1 = scmp.ne.s32.totalorder %s2155_s21, 0 }
  0x5d   : > { %s342_s15 = sand.u32 (!%p2158_p1), 1, %s1692_s28   ;;  %p2159_p9 = scmp.ne.s32.totalorder (!%p2158_p1), %s2147_s20, 0 }
  0x5e   : > { %340 = sbr.rel (%p2158_p1) target bundleno = 1257 (0x4e9), region = 48  ;;  %s1218_s22 = sshll.u32 (!%p2158_p1), %s342_s15, 3 }
  0x5f   : > { %s343_s27 = scalar_lea.sflag (!%p2158_p1), [#allocation3], %s342_s15  ;;  %s1954_s23 = scalar_lea.vmem (!%p2158_p1), [#allocation2], %s1218_s22 }
  0x65   : > { %1663 = dma.done.wait (%p2159_p9), %s343_s27, 128  }
  0x66   : > { %1665 = vsyncadd (%p2159_p9), %s343_s27, 4294967168  ;;  %s352_s18 = scalar_lea.sflag [#allocation6], %s342_s15  ;;  %s1960_s19 = scalar_lea.vmem [#allocation5], %s1218_s22 }
  0x67   : > { %1667 = dma.done.wait (%p2159_p9), %s352_s18, 128  }
  0x68   : > { %1669 = vsyncadd (%p2159_p9), %s352_s18, 4294967168  ;;  %p412_p8 = scmp.lt.s32.totalorder %s1704_s8, 1  ;;  %p417_p4 = scmp.lt.s32.totalorder %s1700_s30, 3  ;;  %v1720_v0 = vmov 0.0|0.0   ;;  %vm1721_vm0 = vmmov 0   ;;  %v1722_v1 = vmov 0.0  }
  0x69   : > { %1352 = vmatprep.subr.bf16.mxu0 %v1720_v0  ;;  %1294 = vmatprep.mubr.msk.f32.mxu0 %vm1721_vm0, %v1722_v1  ;;  %v1723_v2 = vmov 0   ;;  %vm444_vm1 = vcmask 261120   ;;  %v518_v12 = vld [vmem:[%s1954_s23] sm:$0xff]  ;;  %vm710_vm2 = vcmask 64512   ;;  %v598_v29 = vld [vmem:[%s1960_s19] sm:$0xff]  ;;  %vm840_vm3 = vcmask 523264  }
  0x6a   : > { %s413_s2 = scalar_select %p412_p8, %s1704_s8, 1  ;;  %1497 = vset.pattern.permute.xlu0 %v1723_v2  ;;  %vm2037_vm4 = vmpackc.low %vm840_vm3, %vm840_vm3 }
  0x6b   : > { %s418_s21 = scalar_select %p417_p4, %s1700_s30, 3 }
  0x6c   : > { %s1252_s20 = sshll.u32 %s413_s2, 5  ;;  %s409_s10 = sand.u32 1, %s1680_s25  }
  0x6d   : > { %s416_s17 = scalar_lea.vmem %s2122_s0, %s1252_s20  ;;  %s1976_s13 = sshll.u32 %s418_s21, 3 }
  0x6e   : > { %s424_s15 = scalar_lea.vmem %s2126_s4, %s1976_s13  ;;  %v433_v3 = vld [vmem:[%s416_s17] sm:$0xff]  ;;  %v434_v4 = vld [vmem:[%s416_s17 + $0x8] sm:$0xff]  ;;  %v435_v5 = vld [vmem:[%s416_s17 + $0x10] sm:$0xff]  ;;  %s428_s18 = scalar_lea.vmem %s2127_s5, %s1976_s13 }
  0x6f   : > { %v1353_v6 = vpack.c.bf16 %v434_v4, %v433_v3  ;;  %v436_v7 = vld [vmem:[%s416_s17 + $0x18] sm:$0xff]  ;;  %v438_v8 = vld [vmem:[%s424_s15] sm:$0xff]  ;;  %s420_s20 = scalar_lea.vmem %s2123_s1, %s1976_s13  ;;  %s432_s12 = scalar_lea.vmem %s2128_s6, %s1976_s13 }
  0x70   : > { %v1356_v9 = vpack.c.bf16 %v436_v7, %v435_v5  ;;  %441 = vperm.xlu0 %1497, %v438_v8   ;;  %v519_v10 = vld [vmem:[%s428_s18] sm:$0xff]  ;;  %s1220_s17 = sshll.u32 %s409_s10, 3  ;;  %s1248_s13 = sshll.u32 %s1704_s8, 2 }
  0x71   : > { %1354 = vmatpush3.bf16.msra.mxu0 %v1353_v6  ;;  %v437_v11 = vld [vmem:[%s420_s20] sm:$0xff]  ;;  %s1039_s9 = sadd.s32 %s1700_s30, %s1248_s13  ;;  %s411_s15 = scalar_lea.vmem [#allocation7], %s1220_s17 }
  0x72   : > { %1355 = vmatprep.subr.bf16.mxu0 %v1720_v0  ;;  %s1249_s29 = sshll.u32 %s1039_s9, 7  ;;  %s1043_s22 = sshll.u32 %s411_s15, 4  ;;  %s2061_s22 = int_to_ptr.vmem [resolvable:$true] %s1043_s22 }
  0x73   : > { %s2059_s2 = scalar_lea.hbm %s2129_s7, %s1249_s29  ;;  %s1028_s21 = scalar_lea.sflag [#allocation4], %s409_s10 }
  0x74   : > { %522 = vperm.xlu0 %1497, %v519_v10   ;;  %s1590_s8 = scalar_lea.vmem %s2061_s22, 128  ;;  %p2162_p3 = scmp.ne.s32.totalorder %s2149_s16, 0 }
  0x75   : > { %1357 = vmatpush3.bf16.msra.mxu0 %v1356_v9  ;;  %p1591_p11 = scmp.ne.s32.totalorder %s2061_s22, %s1590_s8  ;;  %s1724_s30 = smov [#allocation7]  }
  0x76   : > { %1358 = vmatprep.subr.bf16.mxu0 %v1720_v0  ;;  %s1594_s20 = sshll.u32 %s1724_s30, 4  ;;  %s1595_s20 = int_to_ptr.vmem [resolvable:$false] %s1594_s20 }
  0x77   : > { %p1592_p12 = pnand %p1591_p11, %p2162_p3  ;;  %s1596_s23 = scalar_lea.vmem %s1595_s20, 256 }
  0x78   : > { %1295 = vmatmul.mubr.msk.f32.vlgmr.msra.gmra.mrb[0].mxu0 %vm444_vm1, %v437_v11  ;;  %p1597_p5 = scmp.lt.s32.totalorder %s2061_s22, %s1595_s20  ;;  %p1598_p6 = scmp.lt.s32.totalorder %s1596_s23, %s1590_s8 }
  0x79   : > { %1360 = vmatpush3.bf16.msra.mxu0 %v1353_v6  ;;  %1305 = vmatprep.mubr.msk.f32.mxu0 %vm1721_vm0, %v1722_v1  ;;  %p1593_p0 = pneg %p1592_p12 }
  0x7a   : > { %1361 = vmatprep.subr.bf16.mxu0 %v1720_v0  ;;  %p1599_p13 = por %p1598_p6, %p1597_p5 }
  0x7c   : > { %p1600_p2 = pnand %p1599_p13, %p1593_p0 }
  0x7d   : > { %1363 = vmatpush3.bf16.msra.mxu0 %v1356_v9 }
  0x7e   : > { %1364 = vmatprep.subr.bf16.mxu0 %v1720_v0 }
  0x80   : > { %1306 = vmatmul.mubr.msk.f32.vlgmr.msra.gmra.mrb[2].mxu0 %vm444_vm1, %v518_v12 }
  0x81   : > { %1366 = vmatpush3.bf16.msra.mxu0 %v1353_v6  ;;  %1316 = vmatprep.mubr.msk.f32.mxu0 %vm1721_vm0, %v1722_v1 }
  0x82   : > { %1367 = vmatprep.subr.bf16.mxu0 %v1720_v0 }
  0x85   : > { %1369 = vmatpush3.bf16.msra.mxu0 %v1356_v9 }
  0x88   : > { %1317 = vmatmul.mubr.msk.f32.vlgmr.msra.gmra.mrb[4].mxu0 %vm444_vm1, %v598_v29 }
  0xef   : > { %v442_v13 = vpop.permute.xlu0 %441 }
  0xf3   : > { %v523_v17 = vpop.permute.xlu0 %522 }
 0x14b   : > { %v514_v14 = vpop.f32.mrb[0].mxu0 }
 0x14c   : > { %v1296_v15 = vpop.f32.mrb[1].mxu0  ;;  %v515_v16 = vadd.f32 %v514_v14, %v442_v13 }
 0x14e   : > { %678 = vxpose.xlu1.b32.start.end [1/1] (short) (narrow) %v515_v16, 64 }
 0x153   : > { %v594_v18 = vpop.f32.mrb[2].mxu0 }
 0x154   : > { %v595_v19 = vadd.f32 %v594_v18, %v523_v17  ;;  %v1307_v20 = vpop.f32.mrb[3].mxu0 }
 0x156   : > { %1319 = vmatprep.subr.mxu1 %v595_v19 }
 0x157   : > { %1320 = vmatpush3.msra.mxu1 %v595_v19 }
 0x158   : > { %1370 = vmatprep.subr.bf16.mxu1 %v1720_v0 }
 0x1ce   : > { %v694_v21 = vpop.trf.xlu1 }
 0x1cf   : > { %1321 = vmatprep.mubr.msk.f32.mxu1 %vm710_vm2, %v694_v21 }
 0x1d2   : > { %v695_v22 = vpop.trf.xlu1 }
 0x1d3   : > { %1322 = vmatmul.mubr.msk.f32.vlgmr.msra.gmra.mrb[0].mxu1 %vm710_vm2, %v695_v22 }
 0x1d6   : > { %v696_v23 = vpop.trf.xlu1 }
 0x1d7   : > { %1324 = vmatprep.mubr.msk.f32.mxu1 %vm710_vm2, %v696_v23  ;;  %v599_v23 = vld [vmem:[%s432_s12] sm:$0xff] }
 0x1da   : > { %v697_v24 = vpop.trf.xlu1 }
 0x1db   : > { %1325 = vmatmul.mubr.msk.f32.gmra.mrb[2].mxu1 %vm710_vm2, %v697_v24  ;;  %v674_v24 = vpop.f32.mrb[4].mxu0 }
 0x1de   : > { %v698_v25 = vpop.trf.xlu1 }
 0x1df   : > { %1327 = vmatprep.mubr.msk.f32.mxu1 %vm710_vm2, %v698_v25  ;;  %v1318_v25 = vpop.f32.mrb[5].mxu0 }
 0x1e2   : > { %v699_v26 = vpop.trf.xlu1 }
 0x1e3   : > { %1328 = vmatmul.mubr.msk.f32.gmra.mrb[4].mxu1 %vm710_vm2, %v699_v26 }
 0x1e6   : > { %v700_v27 = vpop.trf.xlu1 }
 0x1e7   : > { %1330 = vmatprep.mubr.msk.f32.mxu1 %vm710_vm2, %v700_v27 }
 0x1ea   : > { %v701_v28 = vpop.trf.xlu1 }
 0x1eb   : > { %1331 = vmatmul.mubr.msk.f32.gmra.mrb[6].mxu1 %vm710_vm2, %v701_v28 }
 0x1ec   : > { %1349 = vmatprep.mubr.msk.f32.mxu1 %vm1721_vm0, %v1722_v1 }
 0x2a6   : > { %v1323_v30 = vpop.f32.mrb[0].mxu1 }
 0x2a7   : > { %v801_v31 = vpop.f32.mrb[1].mxu1  ;;  %v844_v32 = vsel %vm840_vm3, %v1323_v30, -inf }
 0x2a8   : > { %845 = vmax.xlane.f32.xlu0 %v844_v32  ;;  %v841_v33 = vsel %vm840_vm3, %v801_v31, -inf }
 0x2a9   : > { %842 = vmax.xlane.f32.xlu1 %v841_v33 }
 0x2ae   : > { %v1326_v34 = vpop.f32.mrb[2].mxu1 }
 0x2af   : > { %v811_v35 = vpop.f32.mrb[3].mxu1  ;;  %v850_v36 = vsel %vm840_vm3, %v1326_v34, -inf }
 0x2b0   : > { %851 = vmax.xlane.f32.xlu0 %v850_v36  ;;  %v847_v37 = vsel %vm840_vm3, %v811_v35, -inf }
 0x2b4   : > { %848 = vmax.xlane.f32.xlu0 %v847_v37 }
 0x2b6   : > { %v1329_v38 = vpop.f32.mrb[4].mxu1 }
 0x2b7   : > { %v821_v39 = vpop.f32.mrb[5].mxu1  ;;  %v856_v40 = vsel %vm840_vm3, %v1329_v38, -inf }
 0x2b8   : > { %857 = vmax.xlane.f32.xlu0 %v856_v40  ;;  %v853_v41 = vsel %vm840_vm3, %v821_v39, -inf }
 0x2bc   : > { %854 = vmax.xlane.f32.xlu0 %v853_v41 }
 0x2be   : > { %v1332_v42 = vpop.f32.mrb[6].mxu1 }
 0x2bf   : > { %v831_v43 = vpop.f32.mrb[7].mxu1  ;;  %v862_v45 = vsel %vm840_vm3, %v1332_v42, -inf }
 0x2c0   : > { %v859_v44 = vsel %vm840_vm3, %v831_v43, -inf }
 0x2c1   : > { %860 = vmax.xlane.f32.xlu0 %v859_v44 }
 0x2c5   : > { %863 = vmax.xlane.f32.xlu0 %v862_v45 }
 0x335   : > { %v846_v46 = vpop.xlane.xlu0 %845 }
 0x336   : > { %v866_v47 = vsub.f32 %v1323_v30, %v846_v46  ;;  %v843_v48 = vpop.xlane.xlu1 %842 }
 0x337   : > { %v865_v49 = vsub.f32 %v801_v31, %v843_v48 }
 0x338   : > { %v875_v50 = vmul.f32 1.442695, %v866_v47 }
 0x339   : > { %v873_v51 = vmul.f32 1.442695, %v865_v49 }
 0x33b   : > { %1498 = vpow2.f32 %v873_v51 }
 0x33c   : > { %1500 = vpow2.f32 %v875_v50 }
 0x33d   : > { %v852_v52 = vpop.xlane.xlu0 %851 }
 0x33e   : > { %v868_v53 = vsub.f32 %v1326_v34, %v852_v52 }
 0x340   : > { %v879_v54 = vmul.f32 1.442695, %v868_v53 }
 0x341   : > { %v849_v55 = vpop.xlane.xlu0 %848 }
 0x342   : > { %1502 = vpow2.f32 %v879_v54  ;;  %v867_v56 = vsub.f32 %v811_v35, %v849_v55 }
 0x344   : > { %v877_v57 = vmul.f32 1.442695, %v867_v56 }
 0x345   : > { %v1499_v58 = vpop.eup %1498  ;;  %v858_v59 = vpop.xlane.xlu0 %857 }
 0x346   : > { %1504 = vpow2.f32 %v877_v57  ;;  %v870_v60 = vsub.f32 %v1329_v38, %v858_v59  ;;  %v889_v61 = vsel %vm840_vm3, %v1499_v58, 0.0  ;;  %v1501_v62 = vpop.eup %1500 }
 0x347   : > { %890 = vadd.xlane.f32.xlu0 %v889_v61  ;;  %v892_v3 = vsel %vm840_vm3, %v1501_v62, 0.0 }
 0x348   : > { %v883_v63 = vmul.f32 1.442695, %v870_v60 }
 0x349   : > { %v855_v1 = vpop.xlane.xlu0 %854 }
 0x34a   : > { %1506 = vpow2.f32 %v883_v63  ;;  %v869_v2 = vsub.f32 %v821_v39, %v855_v1 }
 0x34b   : > { %893 = vadd.xlane.f32.xlu0 %v892_v3 }
 0x34c   : > { %v1503_v4 = vpop.eup %1502  ;;  %v881_v5 = vmul.f32 1.442695, %v869_v2 }
 0x34d   : > { %v898_v6 = vsel %vm840_vm3, %v1503_v4, 0.0 }
 0x34e   : > { %1508 = vpow2.f32 %v881_v5  ;;  %899 = vadd.xlane.f32.xlu1 %v898_v6  ;;  %v861_v7 = vpop.xlane.xlu0 %860 }
 0x34f   : > { %v871_v8 = vsub.f32 %v831_v43, %v861_v7 }
 0x350   : > { %v1505_v9 = vpop.eup %1504 }
 0x351   : > { %v885_v10 = vmul.f32 1.442695, %v871_v8  ;;  %v895_v11 = vsel %vm840_vm3, %v1505_v9, 0.0 }
 0x352   : > { %896 = vadd.xlane.f32.xlu0 %v895_v11  ;;  %v864_v12 = vpop.xlane.xlu0 %863 }
 0x353   : > { %1510 = vpow2.f32 %v885_v10  ;;  %v872_v13 = vsub.f32 %v1332_v42, %v864_v12 }
 0x354   : > { %v1507_v14 = vpop.eup %1506 }
 0x355   : > { %v887_v15 = vmul.f32 1.442695, %v872_v13  ;;  %v904_v16 = vsel %vm840_vm3, %v1507_v14, 0.0 }
 0x356   : > { %905 = vadd.xlane.f32.xlu1 %v904_v16 }
 0x357   : > { %1512 = vpow2.f32 %v887_v15 }
 0x358   : > { %v1509_v17 = vpop.eup %1508 }
 0x359   : > { %v901_v18 = vsel %vm840_vm3, %v1509_v17, 0.0 }
 0x35a   : > { %902 = vadd.xlane.f32.xlu0 %v901_v18 }
 0x35d   : > { %v1511_v19 = vpop.eup %1510 }
 0x35e   : > { %v907_v20 = vsel %vm840_vm3, %v1511_v19, 0.0 }
 0x35f   : > { %908 = vadd.xlane.f32.xlu0 %v907_v20 }
 0x361   : > { %v1513_v21 = vpop.eup %1512 }
 0x362   : > { %v910_v22 = vsel %vm840_vm3, %v1513_v21, 0.0 }
 0x363   : > { %911 = vadd.xlane.f32.xlu1 %v910_v22 }
 0x375   : > { %602 = vperm.xlu0 %1497, %v599_v23  }
 0x3d4   : > { %v891_v26 = vpop.xlane.xlu0 %890 }
 0x3d5   : > { %1514 = vrcp.f32 %v891_v26 }
 0x3d8   : > { %v894_v27 = vpop.xlane.xlu0 %893 }
 0x3d9   : > { %1516 = vrcp.f32 %v894_v27 }
 0x3db   : > { %v900_v28 = vpop.xlane.xlu1 %899 }
 0x3dc   : > { %1518 = vrcp.f32 %v900_v28 }
 0x3df   : > { %v897_v29 = vpop.xlane.xlu0 %896  ;;  %v1515_v30 = vpop.eup %1514 }
 0x3e0   : > { %1520 = vrcp.f32 %v897_v29  ;;  %v914_v33 = vmul.f32 %v1515_v30, %v1499_v58 }
 0x3e3   : > { %v1517_v31 = vpop.eup %1516  ;;  %v906_v32 = vpop.xlane.xlu1 %905 }
 0x3e4   : > { %v916_v34 = vmul.f32 %v1517_v31, %v1501_v62  ;;  %1522 = vrcp.f32 %v906_v32 }
 0x3e6   : > { %v1371_v36 = vpack.c.bf16 %v916_v34, %v914_v33  ;;  %v1519_v38 = vpop.eup %1518 }
 0x3e7   : > { %v903_v37 = vpop.xlane.xlu0 %902  ;;  %v920_v40 = vmul.f32 %v1519_v38, %v1503_v4 }
 0x3e8   : > { %1524 = vrcp.f32 %v903_v37  ;;  %1373 = vmatpush3.bf16.xpose.msk.msra.mxu1 %vm2037_vm4, %v1371_v36 }
 0x3e9   : > { %1374 = vmatprep.subr.bf16.mxu1 %v1720_v0 }
 0x3ea   : > { %v1521_v39 = vpop.eup %1520 }
 0x3eb   : > { %v918_v41 = vmul.f32 %v1521_v39, %v1505_v9 }
 0x3ec   : > { %v909_v42 = vpop.xlane.xlu0 %908 }
 0x3ed   : > { %v1375_v43 = vpack.c.bf16 %v920_v40, %v918_v41  ;;  %1526 = vrcp.f32 %v909_v42 }
 0x3ee   : > { %v1523_v44 = vpop.eup %1522 }
 0x3ef   : > { %v924_v47 = vmul.f32 %v1523_v44, %v1507_v14 }
 0x3f0   : > { %v912_v45 = vpop.xlane.xlu1 %911  ;;  %1377 = vmatpush3.bf16.xpose.msk.msra.mxu1 %vm2037_vm4, %v1375_v43 }
 0x3f1   : > { %1528 = vrcp.f32 %v912_v45  ;;  %1378 = vmatprep.subr.bf16.mxu1 %v1720_v0 }
 0x3f2   : > { %v1525_v46 = vpop.eup %1524 }
 0x3f3   : > { %v922_v48 = vmul.f32 %v1525_v46, %v1509_v17 }
 0x3f4   : > { %v603_v55 = vpop.permute.xlu0 %602 }
 0x3f5   : > { %v1379_v49 = vpack.c.bf16 %v924_v47, %v922_v48  ;;  %v675_v56 = vadd.f32 %v674_v24, %v603_v55 }
 0x3f7   : > { %v1527_v50 = vpop.eup %1526 }
 0x3f8   : > { %1381 = vmatpush3.bf16.xpose.msk.msra.mxu1 %vm2037_vm4, %v1379_v49  ;;  %v926_v52 = vmul.f32 %v1527_v50, %v1511_v19 }
 0x3f9   : > { %1382 = vmatprep.subr.bf16.mxu1 %v1720_v0 }
 0x3fb   : > { %v1529_v51 = vpop.eup %1528 }
 0x3fc   : > { %v928_v53 = vmul.f32 %v1529_v51, %v1513_v21 }
 0x3fe   : > { %v1383_v54 = vpack.c.bf16 %v928_v53, %v926_v52 }
 0x400   : > { %1385 = vmatpush3.bf16.xpose.msk.msra.mxu1 %vm2037_vm4, %v1383_v54 }
 0x407   : > { %1350 = vmatmul.mubr.msk.f32.vlgmr.msra.gmra.mrb[8].mxu1 %vm840_vm3, %v675_v56 }
 0x4da   : > { %v1022_v0 = vpop.f32.mrb[8].mxu1 }
 0x4db   : > { %1026 = vst.msk [vmem:[%s411_s15] sm:$0xff] %vm840_vm3, %v1022_v0  ;;  %v1351_v57 = vpop.f32.mrb[9].mxu1 }
 0x4dc   : > { %1603 = shalt.err (!%p1600_p2)
}
 0x4dd   : > { %s1604_s19 = scalar_lea.hbm %s2059_s2, 128  ;;  %s1608_s17 = scalar_lea.hbm %s2129_s7, 1024 }
 0x4de   : > { %p1605_p7 = scmp.ne.s32.totalorder %s2059_s2, %s1604_s19  ;;  %p1609_p9 = scmp.lt.u32.totalorder %s2059_s2, %s2129_s7 }
 0x4df   : > { %p1610_p8 = scmp.lt.u32.totalorder %s1608_s17, %s1604_s19  ;;  %p1612_p11 = scmp.lt.u32.totalorder %s1604_s19, %s2059_s2 }
 0x4e0   : > { %p1606_p10 = pnand %p1605_p7, %p2162_p3 }
 0x4e1   : > { %p1611_p4 = por %p1610_p8, %p1609_p9 }
 0x4e2   : > { %p1607_p1 = pneg %p1606_p10 }
 0x4e3   : > { %p1613_p12 = por %p1612_p11, %p1611_p4 }
 0x4e5   : > { %p1614_p0 = pnand %p1613_p12, %p1607_p1 }
 0x4e7   : > { %1617 = shalt.err (!%p1614_p0)
}
 0x4e8   : > { %1390 = dma.vmem_to_hbm [thread:$0]  (%p2162_p3), %s2061_s22, 128, %s2059_s2, %s1028_s21  }
 0x4e9 PF: > { %p1404_p5 = scmp.ge.s32.totalorder %s1716_s11, 2  ;;  %s1055_s29 = sand.u32 1, %s1676_s24  }
 0x4ea   : > { %p2163_p6 = scmp.ne.s32.totalorder %s2150_s14, 0  ;;  %s1056_s15 = scalar_lea.sflag [#allocation4], %s1055_s29 }
 0x4ec   : > { %p1400_p13 = pnand %p1404_p5, %p2163_p6 }
 0x4ee   : > { %1671 = dma.done.wait (!%p1400_p13), %s1056_s15, 128  }
 0x4ef   : > { %1673 = vsyncadd (!%p1400_p13), %s1056_s15, 4294967168  ;;  %s26_s11 = sadd.s32 1, %s1716_s11   ;;  %s2164_s16 = sld [smem:[#allocation17_spill]] }
 0x4f0   : > { %p23_p2 = scmp.ge.s32.totalorder %s26_s11, 10   ;;  %s2165_s18 = sld [smem:[#allocation11_spill]] }
 0x4f1   : > { %s2166_s29 = sld [smem:[#allocation16_spill]]  ;;  %s2167_s30 = sld [smem:[#allocation12_spill]] }
 0x4f2   : > { %s2168_s8 = sld [smem:[#allocation13_spill]]  ;;  %s2169_s9 = sld [smem:[#allocation14_spill]] }
 0x4f3   : > { %s2170_s10 = sld [smem:[#allocation15_spill]]  ;;  %s2171_s24 = smov %s1680_s25 }
 0x4f4   : > { %s2172_s25 = smov %s1684_s26  ;;  %s2174_s27 = smov %s1692_s28 }
 0x4f5   : > { %s2173_s26 = smov %s2164_s16  ;;  %25 = sbr.rel (!%p23_p2) target bundleno = 13 (0xd), region = 121 }
 0x4f6   : > { %s2175_s28 = smov %s2165_s18 }
 0x4fc   :  { %1061 = vsyncpa [#allocation3], 1 }
 0x4fd   :  { %1063 = vsyncpa [#allocation3 + $0x1], 1 }
 0x4fe   :  { %1064 = vsyncpa [#allocation6], 1 }
 0x4ff   :  { %1066 = vsyncpa [#allocation6 + $0x1], 1 }
 0x500   :  { %1067 = vsyncpa [#allocation4], 1 }
 0x501   :  { %1069 = vsyncpa [#allocation4 + $0x1], 1 }

</bundles_post_ra>
